<compile_context>
chip_gen: v7x
topology: tpu7x:2x2x1
jax: 0.10.0
libtpu: 0.0.40
codegen_flags: <defaults>
</compile_context>

<pallas_src>
import functools

import jax
import jax.numpy as jnp
import numpy as np
from jax.experimental import pallas as pl
from jax.experimental.pallas import tpu as pltpu


# Conservative live-buffer VMEM budget: fits under the default 32 MiB scoped limit on
# all generations, including v7x whose physical VMEM is 64 MiB (vs 128 MiB v5e/v6e).
# TODO(synk): query pltpu.get_tpu_info() to size tiles per generation at runtime.
_VMEM_BUDGET_BYTES = 8 * 1024 * 1024


# ---------------------------------------------------------------------------
# Kernel 1: per-channel batch statistics (sum and sum of squares) in one pass.
# ---------------------------------------------------------------------------
def bn_stats_kernel(x_ref, sums_ref):
    """x_ref: [rows_tile, C]; sums_ref: [2, C] accumulator (row 0 = sum, row 1 = sumsq)."""

    @pl.when(pl.program_id(0) == 0)
    def _init():
        sums_ref[...] = jnp.zeros_like(sums_ref)

    x = x_ref[...].astype(jnp.float32)
    s = jnp.sum(x, axis=0, keepdims=True)          # [1, C]
    sq = jnp.sum(x * x, axis=0, keepdims=True)     # [1, C]
    sums_ref[...] += jnp.concatenate([s, sq], axis=0)


# ---------------------------------------------------------------------------
# Kernel 2: BN apply -> ReLU -> 2x2 avg pool -> 1x1 conv (single matmul per tile).
# ---------------------------------------------------------------------------
def transition_kernel(x_ref, scale2_ref, shift2_ref, w_ref, o_ref, *, c, mm_dtype):
    """
    x_ref:      [tr, 2, Wo, 2*C]  (dim 1 = h-parity of the pool window,
                                   last dim = (w-parity, channel) flattened)
    scale2_ref: [1, 2*C]          per-channel BN scale tiled over both w-parities
    shift2_ref: [1, 2*C]
    w_ref:      [C, Cout]         1x1 conv weight, already in matmul dtype
    o_ref:      [tr*Wo, Cout]
    """
    v = x_ref[...].astype(jnp.float32)                        # [tr, 2, Wo, 2C]
    # BN apply + ReLU in f32 (single broadcast of scale/shift over the whole block).
    t = jnp.maximum(v * scale2_ref[...] + shift2_ref[...], 0.0)
    # Average pool BEFORE the (linear) 1x1 conv — exact, 4x less MXU work.
    th = t[:, 0] + t[:, 1]                                    # pool over h-parity [tr, Wo, 2C]
    tp = (th[:, :, :c] + th[:, :, c:]) * 0.25                 # pool over w-parity [tr, Wo, C]
    rows = tp.shape[0] * tp.shape[1]
    t2 = tp.reshape(rows, c).astype(mm_dtype)                 # Wo multiple of 8 -> free reshape
    acc = jnp.dot(t2, w_ref[...], preferred_element_type=jnp.float32)
    o_ref[...] = acc.astype(o_ref.dtype)


# ---------------------------------------------------------------------------
# Tile pickers (largest divisor under a VMEM-derived row cap).
# ---------------------------------------------------------------------------
def _pick_stats_tile(total_rows, cap_rows):
    cap = max(1, min(total_rows, cap_rows))
    for t in range(cap, 0, -1):
        if total_rows % t == 0 and (t % 8 == 0 or t == total_rows):
            return t
    return total_rows


def _pick_main_tile(n_row_pairs, wo, cap_rows):
    cap = max(1, min(n_row_pairs, cap_rows))
    for t in range(cap, 0, -1):
        if n_row_pairs % t == 0 and (t * wo) % 8 == 0:
            return t
    return n_row_pairs  # single full block (exempt from the divisibility rule)


# ---------------------------------------------------------------------------
# Wrapper
# ---------------------------------------------------------------------------
def transition_forward(x_nchw, gamma, beta, w_conv, eps, *, matmul_dtype=jnp.bfloat16):
    """x_nchw: [N, Cin, H, W]; w_conv: [Cout, Cin, 1, 1]. Returns [N, Cout, H//2, W//2]."""
    N, C, H, W = x_nchw.shape
    D = w_conv.shape[0]
    assert H % 2 == 0 and W % 2 == 0, "AvgPool2d(2, 2) expects even spatial dims"
    Ho, Wo = H // 2, W // 2
    NHo = N * Ho
    M = NHo * Wo
    itemsize = jnp.dtype(x_nchw.dtype).itemsize

    # Layout glue: NCHW -> NHWC once, so channels sit on the lane axis.  Everything
    # below is a *free* reshape of this single array (no strided gather/concat copy).
    x_nhwc = jnp.transpose(x_nchw, (0, 2, 3, 1))

    # ---- batch statistics (Pallas kernel 1, sequential accumulate over row tiles) ----
    R = N * H * W
    x_rows = x_nhwc.reshape(R, C)
    stats_cap = max(8, _VMEM_BUDGET_BYTES // (2 * max(C, 128) * itemsize))
    ts = _pick_stats_tile(R, stats_cap)
    sums = pl.pallas_call(
        bn_stats_kernel,
        grid=(R // ts,),
        in_specs=[pl.BlockSpec((ts, C), lambda i: (i, 0))],
        out_specs=pl.BlockSpec((2, C), lambda i: (0, 0)),
        out_shape=jax.ShapeDtypeStruct((2, C), jnp.float32),
        compiler_params=pltpu.CompilerParams(dimension_semantics=("arbitrary",)),
    )(x_rows)

    count = float(N * H * W)
    mean = sums[0] / count
    # E[x^2] - E[x]^2 can cancel for large-mean inputs; clamp at 0 (the module's huge
    # eps keeps rsqrt well-defined regardless).
    var = jnp.maximum(sums[1] / count - mean * mean, 0.0)
    inv = jax.lax.rsqrt(var + eps)
    scale = gamma.astype(jnp.float32) * inv                    # [C]
    shift = beta.astype(jnp.float32) - mean * scale            # [C]
    # The fused kernel's last dim is (w-parity, channel) flattened -> tile the
    # per-channel affine params over both w-parities (hoisted out of the kernel).
    scale2 = jnp.tile(scale, 2).reshape(1, 2 * C)
    shift2 = jnp.tile(shift, 2).reshape(1, 2 * C)

    # ---- fused BN-apply + ReLU + pool + 1x1 conv (Pallas kernel 2) ----
    # Free reshape: [N, H, W, C] -> [N*Ho, 2, Wo, 2*C].
    x4 = x_nhwc.reshape(NHo, 2, Wo, 2 * C)
    w2d = w_conv.reshape(D, C).T.astype(matmul_dtype)          # [Cin, Cout]

    # Row-tile sizing: conservative VMEM budget (padded lane/sublane accounting,
    # double-buffered), additionally capped so there are >= 2 blocks when possible
    # (both v7x TensorCores get work under the "parallel" grid axis).
    sub_wo = -(-Wo // 8) * 8
    in_bytes_per_row = 2 * sub_wo * max(2 * C, 128) * itemsize
    out_bytes_per_row = sub_wo * max(D, 128) * 4
    per_row = 2 * (in_bytes_per_row + out_bytes_per_row)
    cap_rows = max(1, _VMEM_BUDGET_BYTES // per_row)
    if NHo >= 2:
        cap_rows = min(cap_rows, max(1, NHo // 2))
    tr = _pick_main_tile(NHo, Wo, cap_rows)

    kernel = functools.partial(transition_kernel, c=C, mm_dtype=matmul_dtype)
    cost = pl.CostEstimate(
        flops=2 * M * C * D,
        transcendentals=0,
        bytes_accessed=x4.size * itemsize + M * D * 4
        + C * D * jnp.dtype(matmul_dtype).itemsize,
    )
    out2d = pl.pallas_call(
        kernel,
        grid=(NHo // tr,),
        in_specs=[
            pl.BlockSpec((tr, 2, Wo, 2 * C), lambda i: (i, 0, 0, 0)),
            pl.BlockSpec((1, 2 * C), lambda i: (0, 0)),
            pl.BlockSpec((1, 2 * C), lambda i: (0, 0)),
            pl.BlockSpec((C, D), lambda i: (0, 0)),
        ],
        out_specs=pl.BlockSpec((tr * Wo, D), lambda i: (i, 0)),
        out_shape=jax.ShapeDtypeStruct((M, D), jnp.float32),
        compiler_params=pltpu.CompilerParams(dimension_semantics=("parallel",)),
        cost_estimate=cost,
    )(x4, scale2, shift2, w2d)

    out = out2d.reshape(N, Ho, Wo, D)
    return jnp.transpose(out, (0, 3, 1, 2))                    # back to NCHW


def transition_reference(x, gamma, beta, w_conv, eps):
    """Plain-JAX reference mirroring the PyTorch forward (training-mode BN)."""
    mean = x.mean(axis=(0, 2, 3), keepdims=True)
    var = ((x - mean) ** 2).mean(axis=(0, 2, 3), keepdims=True)   # biased
    xn = (x - mean) * jax.lax.rsqrt(var + eps)
    xn = xn * gamma.reshape(1, -1, 1, 1) + beta.reshape(1, -1, 1, 1)
    t = jnp.maximum(xn, 0.0)
    y = jnp.einsum('nchw,dc->ndhw', t, w_conv.reshape(w_conv.shape[0], -1))
    n, d, h, w = y.shape
    return y.reshape(n, d, h // 2, 2, w // 2, 2).mean(axis=(3, 5))


if __name__ == "__main__":
    inp_chl, out_chl = 4, 8
    N, H, W = 2, 16, 16
    # nn.BatchNorm2d(inp_chl, out_chl) passes out_chl as eps -- reproduced exactly.
    eps = float(out_chl)

    key = jax.random.PRNGKey(0)
    kx, kg, kb, kw = jax.random.split(key, 4)
    x = jax.random.normal(kx, (N, inp_chl, H, W), dtype=jnp.float32)
    gamma = 1.0 + 0.1 * jax.random.normal(kg, (inp_chl,), dtype=jnp.float32)
    beta = 0.1 * jax.random.normal(kb, (inp_chl,), dtype=jnp.float32)
    w_conv = 0.1 * jax.random.normal(kw, (out_chl, inp_chl, 1, 1), dtype=jnp.float32)

    ref = jax.block_until_ready(transition_reference(x, gamma, beta, w_conv, eps))

    # Exact-math configuration (f32 matmul operands) -> tight tolerance.
    fwd_f32 = jax.jit(functools.partial(transition_forward, eps=eps,
                                        matmul_dtype=jnp.float32))
    out_f32 = jax.block_until_ready(fwd_f32(x, gamma, beta, w_conv))
    assert out_f32.shape == (N, out_chl, H // 2, W // 2), out_f32.shape
    np.testing.assert_allclose(np.asarray(out_f32), np.asarray(ref), rtol=1e-4, atol=1e-5)

    # Performance configuration (bf16 MXU operands, f32 accumulation) -> bf16 tolerance.
    fwd_bf16 = jax.jit(functools.partial(transition_forward, eps=eps,
                                         matmul_dtype=jnp.bfloat16))
    out_bf16 = jax.block_until_ready(fwd_bf16(x, gamma, beta, w_conv))
    np.testing.assert_allclose(np.asarray(out_bf16), np.asarray(ref), rtol=2e-2, atol=2e-2)

    # TODO(synk): training-mode BatchNorm also updates running_mean/running_var in place;
    # that stateful side effect is not represented (forward output is identical).
    print("KERNEL_OK")
</pallas_src>

<mosaic_0001>
module attributes {stable_mosaic.version = 11 : i64} {
  func.func @bn_stats_kernel(%arg0: i32, %arg1: memref<512x4xf32, #tpu.memory_space<vmem>>, %arg2: memref<2x4xf32, #tpu.memory_space<vmem>>) attributes {dimension_semantics = [#tpu.dimension_semantics<arbitrary>], iteration_bounds = array<i64: 1>, scalar_prefetch = 0 : i64, scratch_operands = 0 : i64, tpu.core_type = #tpu.core_type<tc>, window_params = [{transform_indices = @transform_0, window_bounds = array<i64: 512, 4>}, {pipeline_mode = #tpu.pipeline_mode<synchronous>, transform_indices = @transform_1, window_bounds = array<i64: 2, 4>}]} {
    %c0_i32 = arith.constant 0 : i32
    %0 = arith.cmpi eq, %arg0, %c0_i32 : i32
    %1 = arith.extui %0 : i1 to i32
    %c0_i32_0 = arith.constant 0 : i32
    %2 = arith.cmpi ne, %1, %c0_i32_0 : i32
    scf.if %2 {
      %cst_7 = arith.constant 0.000000e+00 : f32
      %13 = vector.broadcast %cst_7 : f32 to vector<2x4xf32>
      %c0_8 = arith.constant 0 : index
      %c0_9 = arith.constant 0 : index
      %14 = vector.load %arg2[%c0_8, %c0_9] : memref<2x4xf32, #tpu.memory_space<vmem>>, vector<2x4xf32>
      tpu.vector_store %arg2[%c0_8, %c0_9], %13 {strides = array<i32>} : memref<2x4xf32, #tpu.memory_space<vmem>>, vector<2x4xf32>,
    } else {
    }
    %c0 = arith.constant 0 : index
    %c0_1 = arith.constant 0 : index
    %3 = vector.load %arg1[%c0, %c0_1] : memref<512x4xf32, #tpu.memory_space<vmem>>, vector<512x4xf32>
    %cst = arith.constant dense<0.000000e+00> : vector<4xf32>
    %4 = vector.multi_reduction <add>, %3, %cst [0] : vector<512x4xf32> to vector<4xf32>
    %5 = vector.shape_cast %4 : vector<4xf32> to vector<1x4xf32>
    %6 = arith.mulf %3, %3 : vector<512x4xf32>
    %cst_2 = arith.constant dense<0.000000e+00> : vector<4xf32>
    %7 = vector.multi_reduction <add>, %6, %cst_2 [0] : vector<512x4xf32> to vector<4xf32>
    %8 = vector.shape_cast %7 : vector<4xf32> to vector<1x4xf32>
    %c0_3 = arith.constant 0 : index
    %c0_4 = arith.constant 0 : index
    %9 = vector.load %arg2[%c0_3, %c0_4] : memref<2x4xf32, #tpu.memory_space<vmem>>, vector<2x4xf32>
    %10 = tpu.concatenate %5, %8 in 0 : vector<1x4xf32>, vector<1x4xf32> -> vector<2x4xf32>
    %11 = arith.addf %9, %10 : vector<2x4xf32>
    %c0_5 = arith.constant 0 : index
    %c0_6 = arith.constant 0 : index
    %12 = vector.load %arg2[%c0_5, %c0_6] : memref<2x4xf32, #tpu.memory_space<vmem>>, vector<2x4xf32>
    tpu.vector_store %arg2[%c0_5, %c0_6], %11 {strides = array<i32>} : memref<2x4xf32, #tpu.memory_space<vmem>>, vector<2x4xf32>,
    return
  }
  func.func @transform_0(%arg0: i32) -> (i32, i32) {
    %c0_i32 = arith.constant 0 : i32
    %c0_i32_0 = arith.constant 0 : i32
    return %arg0, %c0_i32 : i32, i32
  }
  func.func @transform_1(%arg0: i32) -> (i32, i32) {
    %c0_i32 = arith.constant 0 : i32
    %c0_i32_0 = arith.constant 0 : i32
    %c0_i32_1 = arith.constant 0 : i32
    return %c0_i32, %c0_i32_0 : i32, i32
  }
}

module attributes {stable_mosaic.version = 11 : i64} {
  func.func @transition_kernel(%arg0: i32, %arg1: memref<8x2x8x8xf32, #tpu.memory_space<vmem>>, %arg2: memref<1x8xf32, #tpu.memory_space<vmem>>, %arg3: memref<1x8xf32, #tpu.memory_space<vmem>>, %arg4: memref<4x8xf32, #tpu.memory_space<vmem>>, %arg5: memref<64x8xf32, #tpu.memory_space<vmem>>) attributes {dimension_semantics = [#tpu.dimension_semantics<parallel>], iteration_bounds = array<i64: 2>, scalar_prefetch = 0 : i64, scratch_operands = 0 : i64, tpu.core_type = #tpu.core_type<tc>, window_params = [{transform_indices = @transform_0, window_bounds = array<i64: 8, 2, 8, 8>}, {pipeline_mode = #tpu.pipeline_mode<synchronous>, transform_indices = @transform_1, window_bounds = array<i64: 1, 8>}, {pipeline_mode = #tpu.pipeline_mode<synchronous>, transform_indices = @transform_2, window_bounds = array<i64: 1, 8>}, {pipeline_mode = #tpu.pipeline_mode<synchronous>, transform_indices = @transform_3, window_bounds = array<i64: 4, 8>}, {transform_indices = @transform_4, window_bounds = array<i64: 64, 8>}]} {
    %c0 = arith.constant 0 : index
    %c0_0 = arith.constant 0 : index
    %c0_1 = arith.constant 0 : index
    %c0_2 = arith.constant 0 : index
    %0 = vector.load %arg1[%c0, %c0_0, %c0_1, %c0_2] : memref<8x2x8x8xf32, #tpu.memory_space<vmem>>, vector<8x2x8x8xf32>
    %c0_3 = arith.constant 0 : index
    %c0_4 = arith.constant 0 : index
    %1 = vector.load %arg2[%c0_3, %c0_4] : memref<1x8xf32, #tpu.memory_space<vmem>>, vector<1x8xf32>
    %2 = vector.shape_cast %1 : vector<1x8xf32> to vector<1x1x1x8xf32>
    %3 = vector.broadcast %2 : vector<1x1x1x8xf32> to vector<8x2x8x8xf32>
    %4 = arith.mulf %0, %3 : vector<8x2x8x8xf32>
    %c0_5 = arith.constant 0 : index
    %c0_6 = arith.constant 0 : index
    %5 = vector.load %arg3[%c0_5, %c0_6] : memref<1x8xf32, #tpu.memory_space<vmem>>, vector<1x8xf32>
    %6 = vector.shape_cast %5 : vector<1x8xf32> to vector<1x1x1x8xf32>
    %7 = vector.broadcast %6 : vector<1x1x1x8xf32> to vector<8x2x8x8xf32>
    %8 = arith.addf %4, %7 : vector<8x2x8x8xf32>
    %cst = arith.constant 0.000000e+00 : f32
    %9 = vector.broadcast %cst : f32 to vector<8x2x8x8xf32>
    %10 = arith.maximumf %8, %9 : vector<8x2x8x8xf32>
    %11 = vector.extract_strided_slice %10 {offsets = [0, 0, 0, 0], sizes = [8, 1, 8, 8], strides = [1, 1, 1, 1]} : vector<8x2x8x8xf32> to vector<8x1x8x8xf32>
    %12 = vector.shape_cast %11 : vector<8x1x8x8xf32> to vector<8x8x8xf32>
    %13 = vector.extract_strided_slice %10 {offsets = [0, 1, 0, 0], sizes = [8, 1, 8, 8], strides = [1, 1, 1, 1]} : vector<8x2x8x8xf32> to vector<8x1x8x8xf32>
    %14 = vector.shape_cast %13 : vector<8x1x8x8xf32> to vector<8x8x8xf32>
    %15 = arith.addf %12, %14 : vector<8x8x8xf32>
    %16 = vector.extract_strided_slice %15 {offsets = [0, 0, 0], sizes = [8, 8, 4], strides = [1, 1, 1]} : vector<8x8x8xf32> to vector<8x8x4xf32>
    %17 = vector.extract_strided_slice %15 {offsets = [0, 0, 4], sizes = [8, 8, 4], strides = [1, 1, 1]} : vector<8x8x8xf32> to vector<8x8x4xf32>
    %18 = arith.addf %16, %17 : vector<8x8x4xf32>
    %cst_7 = arith.constant 2.500000e-01 : f32
    %19 = vector.broadcast %cst_7 : f32 to vector<8x8x4xf32>
    %20 = arith.mulf %18, %19 : vector<8x8x4xf32>
    %21 = vector.shape_cast %20 : vector<8x8x4xf32> to vector<64x4xf32>
    %c0_8 = arith.constant 0 : index
    %c0_9 = arith.constant 0 : index
    %22 = vector.load %arg4[%c0_8, %c0_9] : memref<4x8xf32, #tpu.memory_space<vmem>>, vector<4x8xf32>
    %cst_10 = arith.constant dense<0.000000e+00> : vector<64x8xf32>
    %23 = tpu.matmul %21, %22, %cst_10 {dimension_numbers = #tpu.dot_dimension_numbers<[1], [0], [0], [1], [0, 0, 1, 1], [], []>} : vector<64x4xf32>, vector<4x8xf32>, vector<64x8xf32> -> vector<64x8xf32>
    %c0_11 = arith.constant 0 : index
    %c0_12 = arith.constant 0 : index
    %24 = vector.load %arg5[%c0_11, %c0_12] : memref<64x8xf32, #tpu.memory_space<vmem>>, vector<64x8xf32>
    tpu.vector_store %arg5[%c0_11, %c0_12], %23 {strides = array<i32>} : memref<64x8xf32, #tpu.memory_space<vmem>>, vector<64x8xf32>,
    return
  }
  func.func @transform_0(%arg0: i32) -> (i32, i32, i32, i32) {
    %c0_i32 = arith.constant 0 : i32
    %c0_i32_0 = arith.constant 0 : i32
    %c0_i32_1 = arith.constant 0 : i32
    %c0_i32_2 = arith.constant 0 : i32
    return %arg0, %c0_i32, %c0_i32_0, %c0_i32_1 : i32, i32, i32, i32
  }
  func.func @transform_1(%arg0: i32) -> (i32, i32) {
    %c0_i32 = arith.constant 0 : i32
    %c0_i32_0 = arith.constant 0 : i32
    %c0_i32_1 = arith.constant 0 : i32
    return %c0_i32, %c0_i32_0 : i32, i32
  }
  func.func @transform_2(%arg0: i32) -> (i32, i32) {
    %c0_i32 = arith.constant 0 : i32
    %c0_i32_0 = arith.constant 0 : i32
    %c0_i32_1 = arith.constant 0 : i32
    return %c0_i32, %c0_i32_0 : i32, i32
  }
  func.func @transform_3(%arg0: i32) -> (i32, i32) {
    %c0_i32 = arith.constant 0 : i32
    %c0_i32_0 = arith.constant 0 : i32
    %c0_i32_1 = arith.constant 0 : i32
    return %c0_i32, %c0_i32_0 : i32, i32
  }
  func.func @transform_4(%arg0: i32) -> (i32, i32) {
    %c0_i32 = arith.constant 0 : i32
    %c0_i32_0 = arith.constant 0 : i32
    return %arg0, %c0_i32 : i32, i32
  }
}

</mosaic_0001>

<bundles_post_ra>
// kernel: tile.18
= control target key start
LH: loop header
LB: loop body
LE: loop exit
PB: predicated region body
PF: predicated region fallthrough
CT: control target
= control target key end

     0   :  { %s22_s0 = inlined_call_operand.vmem [shape: f32[4], index: 0, kind: input, shape index: {}]   ;;  %s23_s1 = inlined_call_operand.vmem [shape: f32[2,4], index: 1, kind: output, shape index: {}]  }
   0x1   :  { %v4_v0 = vld [vmem:[%s22_s0] ss:$0 sm:$0xff] }
   0x2   :  { %5 = vst [vmem:[%s23_s1] sm:$0x3] %v4_v0 }

// kernel: tile.19
= control target key start
LH: loop header
LB: loop body
LE: loop exit
PB: predicated region body
PF: predicated region fallthrough
CT: control target
= control target key end

     0   :  { %vm7_vm0 = vcmask 31744   ;;  %vm13_vm1 = vcmask 64544   ;;  %s39_s0 = inlined_call_operand.vmem [shape: f32[2,4], index: 0, kind: input, shape index: {}]   ;;  %s40_s1 = inlined_call_operand.vmem [shape: f32[1,8], index: 1, kind: output, shape index: {}]  }
   0x1   :  { %v4_v0 = vld [vmem:[%s39_s0] sm:$0x3]  ;;  %s22_s0 = smov 4  }
   0x2   :  { %5 = vst [vmem:[#allocation1] sm:$0x3] %v4_v0 }
   0x9   :  { %v10_v1 = vld [vmem:[#allocation1 + $0x1] sm:$0x1]   ;;  %v6_v2 = vld [vmem:[#allocation1] sm:$0x1]  }
   0xa   :  { %11 = vrot.lane.b32.xlu0 %v10_v1, %s22_s0  ;;  %8 = vst.msk [vmem:[#allocation0] sm:$0x1] %vm7_vm0, %v6_v2  }
  0x7c   :  { %v12_v3 = vpop.permute.xlu0 %11  }
  0x7d   :  { %14 = vst.msk [vmem:[#allocation0] sm:$0x1] %vm13_vm1, %v12_v3  }
  0x84   :  { %v18_v4 = vld [vmem:[#allocation0] sm:$0x1] }
  0x85   :  { %20 = vst [vmem:[%s40_s1] sm:$0x1] %v18_v4 }

// kernel: transition_forward.2
= control target key start
LH: loop header
LB: loop body
LE: loop exit
PB: predicated region body
PF: predicated region fallthrough
CT: control target
= control target key end

     0   :  { %vm12_vm0 = vcmask 25600   ;;  %vm78_vm1 = vcmask 31744   ;;  %v420_v0 = vmov 0.0   ;;  %vm410_vm2 = vcmask 1040384   ;;  %s1294_s0 = inlined_call_operand.vmem [shape: f32[512,4], index: 0, kind: input, shape index: {}]   ;;  %s1295_s1 = inlined_call_operand.vmem [shape: f32[2,4], index: 1, kind: output, shape index: {}]  }
   0x1   :  { %13 = vst.msk [vmem:[%s1295_s1] sm:$0x3] %vm12_vm0, %v420_v0  ;;  %v438_v1 = vld [vmem:[%s1294_s0] sm:$0xff]  ;;  %v443_v2 = vld [vmem:[%s1294_s0 + $0x8] sm:$0xff]  ;;  %v448_v3 = vld [vmem:[%s1294_s0 + $0x10] sm:$0xff] }
   0x2   :  { %v79_v4 = vsel %vm78_vm1, %v438_v1, 0.0  ;;  %v80_v5 = vsel %vm78_vm1, %v443_v2, 0.0  ;;  %v82_v6 = vsel %vm78_vm1, %v448_v3, 0.0  ;;  %v459_v7 = vld [vmem:[%s1294_s0 + $0x18] sm:$0xff]  ;;  %v466_v10 = vld [vmem:[%s1294_s0 + $0x20] sm:$0xff]  ;;  %v473_v13 = vld [vmem:[%s1294_s0 + $0x28] sm:$0xff] }
   0x3   :  { %v81_v8 = vadd.f32 %v80_v5, %v79_v4  ;;  %v84_v9 = vsel %vm78_vm1, %v459_v7, 0.0  ;;  %v86_v12 = vsel %vm78_vm1, %v466_v10, 0.0  ;;  %v88_v15 = vsel %vm78_vm1, %v473_v13, 0.0  ;;  %v480_v16 = vld [vmem:[%s1294_s0 + $0x30] sm:$0xff]  ;;  %v485_v18 = vld [vmem:[%s1294_s0 + $0x38] sm:$0xff]  ;;  %v490_v19 = vld [vmem:[%s1294_s0 + $0x40] sm:$0xff] }
   0x4   :  { %v90_v20 = vsel %vm78_vm1, %v480_v16, 0.0  ;;  %v497_v21 = vld [vmem:[%s1294_s0 + $0x48] sm:$0xff]  ;;  %v502_v22 = vld [vmem:[%s1294_s0 + $0x50] sm:$0xff]  ;;  %v507_v23 = vld [vmem:[%s1294_s0 + $0x58] sm:$0xff]  ;;  %v92_v25 = vsel %vm78_vm1, %v485_v18, 0.0  ;;  %v94_v26 = vsel %vm78_vm1, %v490_v19, 0.0 }
   0x5   :  { %v83_v11 = vadd.f32 %v82_v6, %v81_v8  ;;  %v516_v27 = vld [vmem:[%s1294_s0 + $0x108] sm:$0xff]  ;;  %v521_v28 = vld [vmem:[%s1294_s0 + $0x110] sm:$0xff]  ;;  %v526_v29 = vld [vmem:[%s1294_s0 + $0x118] sm:$0xff]  ;;  %v96_v30 = vsel %vm78_vm1, %v497_v21, 0.0  ;;  %v98_v31 = vsel %vm78_vm1, %v502_v22, 0.0  ;;  %v534_v32 = vsel %vm78_vm1, %v507_v23, 0.0 }
   0x6   :  { %v539_v33 = vld [vmem:[%s1294_s0 + $0x120] sm:$0xff]  ;;  %v544_v34 = vld [vmem:[%s1294_s0 + $0x128] sm:$0xff]  ;;  %v549_v35 = vld [vmem:[%s1294_s0 + $0x130] sm:$0xff]  ;;  %v553_v37 = vsel %vm78_vm1, %v516_v27, 0.0  ;;  %v557_v38 = vsel %vm78_vm1, %v521_v28, 0.0  ;;  %v561_v39 = vsel %vm78_vm1, %v526_v29, 0.0 }
   0x7   :  { %v85_v14 = vadd.f32 %v84_v9, %v83_v11  ;;  %1314 = vst [vmem:[#allocation2_spill] sm:$0xff] %v553_v37  ;;  %1315 = vst [vmem:[#allocation3_spill] sm:$0xff] %v557_v38  ;;  %v566_v40 = vld [vmem:[%s1294_s0 + $0x138] sm:$0xff]  ;;  %v571_v41 = vld [vmem:[%s1294_s0 + $0x140] sm:$0xff]  ;;  %v580_v43 = vsel %vm78_vm1, %v539_v33, 0.0  ;;  %v584_v44 = vsel %vm78_vm1, %v544_v34, 0.0  ;;  %v214_v37 = vmul.f32 %v448_v3, %v448_v3 }
   0x8   :  { %1316 = vst [vmem:[#allocation4_spill] sm:$0xff] %v561_v39  ;;  %v576_v42 = vld [vmem:[%s1294_s0 + $0x148] sm:$0xff]  ;;  %1317 = vst [vmem:[#allocation5_spill] sm:$0xff] %v580_v43  ;;  %v588_v45 = vsel %vm78_vm1, %v549_v35, 0.0  ;;  %v593_v46 = vld [vmem:[%s1294_s0 + $0x150] sm:$0xff]  ;;  %v607_v50 = vsel %vm78_vm1, %v566_v40, 0.0 }
   0x9   :  { %v87_v17 = vadd.f32 %v86_v12, %v85_v14  ;;  %1318 = vst [vmem:[#allocation6_spill] sm:$0xff] %v584_v44  ;;  %1319 = vst [vmem:[#allocation7_spill] sm:$0xff] %v588_v45  ;;  %v598_v47 = vld [vmem:[%s1294_s0 + $0x158] sm:$0xff]  ;;  %v603_v48 = vld [vmem:[%s1294_s0 + $0x160] sm:$0xff]  ;;  %v611_v51 = vsel %vm78_vm1, %v571_v41, 0.0  ;;  %v615_v52 = vsel %vm78_vm1, %v576_v42, 0.0 }
   0xa   :  { %1320 = vst [vmem:[#allocation8_spill] sm:$0xff] %v607_v50  ;;  %1321 = vst [vmem:[#allocation9_spill] sm:$0xff] %v611_v51  ;;  %v620_v53 = vld [vmem:[%s1294_s0 + $0x168] sm:$0xff]  ;;  %v625_v54 = vld [vmem:[%s1294_s0 + $0x170] sm:$0xff]  ;;  %v634_v56 = vsel %vm78_vm1, %v593_v46, 0.0  ;;  %v638_v57 = vsel %vm78_vm1, %v598_v47, 0.0 }
   0xb   :  { %v89_v24 = vadd.f32 %v88_v15, %v87_v17  ;;  %1322 = vst [vmem:[#allocation10_spill] sm:$0xff] %v615_v52  ;;  %v630_v55 = vld [vmem:[%s1294_s0 + $0x178] sm:$0xff]  ;;  %1323 = vst [vmem:[#allocation11_spill] sm:$0xff] %v634_v56  ;;  %v642_v58 = vsel %vm78_vm1, %v603_v48, 0.0  ;;  %v647_v59 = vld [vmem:[%s1294_s0 + $0x180] sm:$0xff]  ;;  %v661_v63 = vsel %vm78_vm1, %v620_v53, 0.0 }
   0xc   :  { %1324 = vst [vmem:[#allocation12_spill] sm:$0xff] %v638_v57  ;;  %1325 = vst [vmem:[#allocation13_spill] sm:$0xff] %v642_v58  ;;  %v652_v60 = vld [vmem:[%s1294_s0 + $0x188] sm:$0xff]  ;;  %v657_v61 = vld [vmem:[%s1294_s0 + $0x190] sm:$0xff]  ;;  %v665_v0 = vsel %vm78_vm1, %v625_v54, 0.0  ;;  %v669_v4 = vsel %vm78_vm1, %v630_v55, 0.0 }
   0xd   :  { %v91_v36 = vadd.f32 %v90_v20, %v89_v24  ;;  %1326 = vst [vmem:[#allocation14_spill] sm:$0xff] %v661_v63  ;;  %1327 = vst [vmem:[#allocation15_spill] sm:$0xff] %v665_v0  ;;  %v674_v5 = vld [vmem:[%s1294_s0 + $0x198] sm:$0xff]  ;;  %v679_v6 = vld [vmem:[%s1294_s0 + $0x1a0] sm:$0xff]  ;;  %v688_v9 = vsel %vm78_vm1, %v647_v59, 0.0  ;;  %v692_v11 = vsel %vm78_vm1, %v652_v60, 0.0 }
   0xe   :  { %1328 = vst [vmem:[#allocation16_spill] sm:$0xff] %v669_v4  ;;  %v684_v8 = vld [vmem:[%s1294_s0 + $0x1a8] sm:$0xff]  ;;  %1329 = vst [vmem:[#allocation17_spill] sm:$0xff] %v688_v9  ;;  %v696_v12 = vsel %vm78_vm1, %v657_v61, 0.0  ;;  %v701_v14 = vld [vmem:[%s1294_s0 + $0x60] sm:$0xff] }
   0xf   :  { %v93_v49 = vadd.f32 %v92_v25, %v91_v36  ;;  %1330 = vst [vmem:[#allocation18_spill] sm:$0xff] %v692_v11  ;;  %1331 = vst [vmem:[#allocation19_spill] sm:$0xff] %v696_v12  ;;  %v706_v15 = vld [vmem:[%s1294_s0 + $0x1b0] sm:$0xff]  ;;  %v711_v17 = vld [vmem:[%s1294_s0 + $0x1b8] sm:$0xff]  ;;  %v720_v25 = vsel %vm78_vm1, %v674_v5, 0.0  ;;  %v728_v36 = vsel %vm78_vm1, %v684_v8, 0.0 }
  0x10   :  { %v716_v20 = vld [vmem:[%s1294_s0 + $0x1c0] sm:$0xff]  ;;  %1332 = vst [vmem:[#allocation20_spill] sm:$0xff] %v720_v25  ;;  %1334 = vst [vmem:[#allocation22_spill] sm:$0xff] %v728_v36  ;;  %v751_v36 = vsel %vm78_vm1, %v711_v17, 0.0  ;;  %v765_v11 = vld [vmem:[%s1294_s0 + $0x1e8] sm:$0xff] }
  0x11   :  { %v95_v62 = vadd.f32 %v94_v26, %v93_v49  ;;  %v724_v26 = vsel %vm78_vm1, %v679_v6, 0.0  ;;  %v733_v49 = vld [vmem:[%s1294_s0 + $0x1c8] sm:$0xff]  ;;  %1336 = vst [vmem:[#allocation24_spill] sm:$0xff] %v751_v36  ;;  %v755_v25 = vsel %vm78_vm1, %v716_v20, 0.0  ;;  %v760_v12 = vld [vmem:[%s1294_s0 + $0x1e0] sm:$0xff]  ;;  %v787_v0 = vld [vmem:[%s1294_s0 + $0x1f8] sm:$0xff] }
  0x12   :  { %1333 = vst [vmem:[#allocation21_spill] sm:$0xff] %v724_v26  ;;  %v747_v26 = vsel %vm78_vm1, %v706_v15, 0.0  ;;  %1337 = vst [vmem:[#allocation25_spill] sm:$0xff] %v755_v25  ;;  %v774_v9 = vsel %vm78_vm1, %v733_v49, 0.0  ;;  %v809_v58 = vsel %vm78_vm1, %v787_v0, 0.0  ;;  %v838_v56 = vld [vmem:[%s1294_s0 + $0x90] sm:$0xff] }
  0x13   :  { %v97_v24 = vadd.f32 %v96_v30, %v95_v62  ;;  %v738_v30 = vld [vmem:[%s1294_s0 + $0x1d0] sm:$0xff]  ;;  %v743_v62 = vld [vmem:[%s1294_s0 + $0x1d8] sm:$0xff]  ;;  %1335 = vst [vmem:[#allocation23_spill] sm:$0xff] %v747_v26  ;;  %1339 = vst [vmem:[#allocation27_spill] sm:$0xff] %v774_v9  ;;  %v797_v9 = vsel %vm78_vm1, %v765_v11, 0.0 }
  0x14   :  { %v770_v26 = vld [vmem:[%s1294_s0 + $0x1f0] sm:$0xff]  ;;  %v778_v25 = vsel %vm78_vm1, %v738_v30, 0.0  ;;  %v782_v4 = vsel %vm78_vm1, %v743_v62, 0.0  ;;  %1342 = vst [vmem:[#allocation30_spill] sm:$0xff] %v787_v0  ;;  %1344 = vst [vmem:[#allocation32_spill] sm:$0xff] %v797_v9  ;;  %v843_v52 = vld [vmem:[%s1294_s0 + $0x98] sm:$0xff] }
  0x15   :  { %1338 = vst [vmem:[#allocation26_spill] sm:$0xff] %v770_v26  ;;  %v99_v36 = vadd.f32 %v98_v31, %v97_v24  ;;  %1340 = vst [vmem:[#allocation28_spill] sm:$0xff] %v778_v25  ;;  %v102_v31 = vsel %vm78_vm1, %v701_v14, 0.0  ;;  %v793_v24 = vsel %vm78_vm1, %v760_v12, 0.0  ;;  %v801_v25 = vsel %vm78_vm1, %v770_v26, 0.0  ;;  %v28_v9 = vld [vmem:[%s1294_s0 + $0x70] sm:$0xff] }
  0x16   :  { %1341 = vst [vmem:[#allocation29_spill] sm:$0xff] %v782_v4  ;;  %1343 = vst [vmem:[#allocation31_spill] sm:$0xff] %v793_v24  ;;  %v27_v4 = vld [vmem:[%s1294_s0 + $0x68] sm:$0xff]  ;;  %v848_v51 = vld [vmem:[%s1294_s0 + $0xa0] sm:$0xff]  ;;  %v116_v39 = vsel %vm78_vm1, %v843_v52, 0.0 }
  0x17   :  { %1345 = vst [vmem:[#allocation33_spill] sm:$0xff] %v801_v25  ;;  %v101_v63 = vadd.f32 %v534_v32, %v99_v36  ;;  %1346 = vst [vmem:[#allocation34_spill] sm:$0xff] %v809_v58  ;;  %v104_v24 = vsel %vm78_vm1, %v27_v4, 0.0  ;;  %v818_v25 = vld [vmem:[%s1294_s0 + $0x78] sm:$0xff]  ;;  %v823_v32 = vld [vmem:[%s1294_s0 + $0x80] sm:$0xff]  ;;  %v106_v58 = vsel %vm78_vm1, %v28_v9, 0.0 }
  0x18   :  { %1347 = vst [vmem:[#allocation35_spill] sm:$0xff] %v818_v25  ;;  %1348 = vst [vmem:[#allocation36_spill] sm:$0xff] %v823_v32  ;;  %v828_v36 = vld [vmem:[%s1294_s0 + $0x88] sm:$0xff]  ;;  %v864_v43 = vld [vmem:[%s1294_s0 + $0xb0] sm:$0xff]  ;;  %v118_v38 = vsel %vm78_vm1, %v848_v51, 0.0 }
  0x19   :  { %v103_v57 = vadd.f32 %v102_v31, %v101_v63  ;;  %1349 = vst [vmem:[#allocation37_spill] sm:$0xff] %v828_v36  ;;  %v212_v63 = vmul.f32 %v438_v1, %v438_v1  ;;  %v213_v31 = vmul.f32 %v443_v2, %v443_v2  ;;  %1350 = vst [vmem:[#allocation38_spill] sm:$0xff] %v838_v56  ;;  %v108_v1 = vsel %vm78_vm1, %v818_v25, 0.0  ;;  %v859_v44 = vld [vmem:[%s1294_s0 + $0xa8] sm:$0xff]  ;;  %v905_v0 = vld [vmem:[%s1294_s0 + $0xd8] sm:$0xff] }
  0x1a   :  { %1351 = vst [vmem:[#allocation39_spill] sm:$0xff] %v843_v52  ;;  %1352 = vst [vmem:[#allocation40_spill] sm:$0xff] %v848_v51  ;;  %v110_v2 = vsel %vm78_vm1, %v823_v32, 0.0  ;;  %v112_v45 = vsel %vm78_vm1, %v828_v36, 0.0  ;;  %v882_v36 = vld [vmem:[%s1294_s0 + $0xc0] sm:$0xff]  ;;  %v887_v32 = vld [vmem:[%s1294_s0 + $0xc8] sm:$0xff]  ;;  %v215_v25 = vmul.f32 %v459_v7, %v459_v7 }
  0x1b   :  { %v105_v50 = vadd.f32 %v104_v24, %v103_v57  ;;  %1353 = vst [vmem:[#allocation41_spill] sm:$0xff] %v859_v44  ;;  %1354 = vst [vmem:[#allocation42_spill] sm:$0xff] %v864_v43  ;;  %v869_v57 = vld [vmem:[%s1294_s0 + $0xb8] sm:$0xff]  ;;  %v114_v24 = vsel %vm78_vm1, %v838_v56, 0.0  ;;  %v892_v52 = vld [vmem:[%s1294_s0 + $0xd0] sm:$0xff]  ;;  %v120_v51 = vsel %vm78_vm1, %v859_v44, 0.0 }
  0x1c   :  { %1355 = vst [vmem:[#allocation43_spill] sm:$0xff] %v869_v57  ;;  %1356 = vst [vmem:[#allocation44_spill] sm:$0xff] %v882_v36  ;;  %v898_v3 = vsel %vm78_vm1, %v864_v43, 0.0  ;;  %v910_v26 = vld [vmem:[%s1294_s0 + $0xe0] sm:$0xff]  ;;  %v922_v7 = vsel %vm78_vm1, %v887_v32, 0.0  ;;  %v926_v43 = vsel %vm78_vm1, %v892_v52, 0.0 }
  0x1d   :  { %1357 = vst [vmem:[#allocation45_spill] sm:$0xff] %v887_v32  ;;  %1358 = vst [vmem:[#allocation46_spill] sm:$0xff] %v892_v52  ;;  %v107_v56 = vadd.f32 %v106_v58, %v105_v50  ;;  %v914_v50 = vsel %vm78_vm1, %v869_v57, 0.0  ;;  %v918_v58 = vsel %vm78_vm1, %v882_v36, 0.0  ;;  %v931_v44 = vld [vmem:[%s1294_s0 + $0xe8] sm:$0xff]  ;;  %v936_v57 = vld [vmem:[%s1294_s0 + $0xf0] sm:$0xff]  ;;  %v216_v52 = vmul.f32 %v466_v10, %v466_v10 }
  0x1e   :  { %1359 = vst [vmem:[#allocation47_spill] sm:$0xff] %v905_v0  ;;  %1360 = vst [vmem:[#allocation48_spill] sm:$0xff] %v910_v26  ;;  %v944_v32 = vsel %vm78_vm1, %v910_v26, 0.0  ;;  %v219_v26 = vmul.f32 %v485_v18, %v485_v18  ;;  %v220_v10 = vmul.f32 %v490_v19, %v490_v19  ;;  %v245_v18 = vmul.f32 %v516_v27, %v516_v27 }
  0x1f   :  { %1361 = vst [vmem:[#allocation49_spill] sm:$0xff] %v918_v58  ;;  %1362 = vst [vmem:[#allocation50_spill] sm:$0xff] %v922_v7  ;;  %v109_v36 = vadd.f32 %v108_v1, %v107_v56  ;;  %v940_v58 = vsel %vm78_vm1, %v905_v0, 0.0  ;;  %v954_v7 = vsel %vm78_vm1, %v936_v57, 0.0  ;;  %v217_v56 = vmul.f32 %v473_v13, %v473_v13 }
  0x20   :  { %1363 = vst [vmem:[#allocation51_spill] sm:$0xff] %v926_v43  ;;  %1364 = vst [vmem:[#allocation52_spill] sm:$0xff] %v931_v44  ;;  %v950_v43 = vsel %vm78_vm1, %v931_v44, 0.0  ;;  %v218_v1 = vmul.f32 %v480_v16, %v480_v16  ;;  %v221_v44 = vmul.f32 %v497_v21, %v497_v21  ;;  %v224_v13 = vmul.f32 %v701_v14, %v701_v14 }
  0x21   :  { %1365 = vst [vmem:[#allocation53_spill] sm:$0xff] %v936_v57  ;;  %1366 = vst [vmem:[#allocation54_spill] sm:$0xff] %v954_v7  ;;  %v111_v0 = vadd.f32 %v110_v2, %v109_v36  ;;  %v222_v57 = vmul.f32 %v502_v22, %v502_v22  ;;  %v223_v7 = vmul.f32 %v507_v23, %v507_v23 }
  0x22   :  { %v972_v16 = vmul.f32 %v27_v4, %v27_v4  ;;  %v974_v2 = vmul.f32 %v28_v9, %v28_v9  ;;  %v246_v19 = vmul.f32 %v521_v28, %v521_v28  ;;  %v247_v21 = vmul.f32 %v526_v29, %v526_v29 }
  0x23   :  { %v113_v36 = vadd.f32 %v112_v45, %v111_v0  ;;  %v248_v22 = vmul.f32 %v539_v33, %v539_v33  ;;  %v249_v23 = vmul.f32 %v544_v34, %v544_v34  ;;  %v250_v45 = vmul.f32 %v549_v35, %v549_v35 }
  0x24   :  { %v251_v4 = vmul.f32 %v566_v40, %v566_v40  ;;  %v252_v27 = vmul.f32 %v571_v41, %v571_v41  ;;  %v253_v28 = vmul.f32 %v576_v42, %v576_v42  ;;  %v254_v29 = vmul.f32 %v593_v46, %v593_v46 }
  0x25   :  { %v115_v0 = vadd.f32 %v114_v24, %v113_v36  ;;  %v255_v33 = vmul.f32 %v598_v47, %v598_v47  ;;  %v276_v34 = vsel %vm78_vm1, %v212_v63, 0.0  ;;  %v277_v35 = vsel %vm78_vm1, %v213_v31, 0.0 }
  0x26   :  { %v256_v40 = vmul.f32 %v603_v48, %v603_v48  ;;  %v278_v14 = vadd.f32 %v277_v35, %v276_v34  ;;  %v279_v41 = vsel %vm78_vm1, %v214_v37, 0.0  ;;  %v257_v42 = vmul.f32 %v620_v53, %v620_v53  ;;  %v1368_v34 = vld [vmem:[#allocation30_spill] sm:$0xff] }
  0x27   :  { %v117_v9 = vadd.f32 %v116_v39, %v115_v0  ;;  %v258_v46 = vmul.f32 %v625_v54, %v625_v54  ;;  %v259_v47 = vmul.f32 %v630_v55, %v630_v55  ;;  %v281_v63 = vsel %vm78_vm1, %v215_v25, 0.0  ;;  %v1367_v0 = vld [vmem:[#allocation26_spill] sm:$0xff] }
  0x28   :  { %v260_v39 = vmul.f32 %v647_v59, %v647_v59  ;;  %v261_v48 = vmul.f32 %v652_v60, %v652_v60  ;;  %v280_v31 = vadd.f32 %v279_v41, %v278_v14  ;;  %v262_v37 = vmul.f32 %v657_v61, %v657_v61  ;;  %v1369_v41 = vld [vmem:[#allocation49_spill] sm:$0xff] }
  0x29   :  { %v119_v24 = vadd.f32 %v118_v38, %v117_v9  ;;  %v263_v53 = vmul.f32 %v674_v5, %v674_v5  ;;  %v264_v54 = vmul.f32 %v679_v6, %v679_v6  ;;  %v283_v55 = vsel %vm78_vm1, %v216_v52, 0.0 }
  0x2a   :  { %v265_v38 = vmul.f32 %v684_v8, %v684_v8  ;;  %v266_v59 = vmul.f32 %v706_v15, %v706_v15  ;;  %v282_v60 = vadd.f32 %v281_v63, %v280_v31  ;;  %v267_v36 = vmul.f32 %v711_v17, %v711_v17 }
  0x2b   :  { %v121_v25 = vadd.f32 %v120_v51, %v119_v24  ;;  %v268_v61 = vmul.f32 %v716_v20, %v716_v20  ;;  %v269_v5 = vmul.f32 %v733_v49, %v733_v49  ;;  %v285_v6 = vsel %vm78_vm1, %v217_v56, 0.0 }
  0x2c   :  { %v270_v52 = vmul.f32 %v738_v30, %v738_v30  ;;  %v271_v8 = vmul.f32 %v743_v62, %v743_v62  ;;  %v284_v15 = vadd.f32 %v283_v55, %v282_v60  ;;  %v272_v17 = vmul.f32 %v760_v12, %v760_v12 }
  0x2d   :  { %v123_v51 = vadd.f32 %v898_v3, %v121_v25  ;;  %v273_v20 = vmul.f32 %v765_v11, %v765_v11  ;;  %v274_v49 = vmul.f32 %v1367_v0, %v1367_v0  ;;  %v287_v56 = vsel %vm78_vm1, %v218_v1, 0.0  ;;  %v1371_v25 = vld [vmem:[#allocation51_spill] sm:$0xff] }
  0x2e   :  { %v275_v30 = vmul.f32 %v1368_v34, %v1368_v34  ;;  %v286_v35 = vadd.f32 %v285_v6, %v284_v15  ;;  %v289_v62 = vsel %vm78_vm1, %v219_v26, 0.0  ;;  %v291_v9 = vsel %vm78_vm1, %v220_v10, 0.0  ;;  %v1373_v34 = vld [vmem:[#allocation54_spill] sm:$0xff] }
  0x2f   :  { %v125_v3 = vadd.f32 %v914_v50, %v123_v51  ;;  %v293_v12 = vsel %vm78_vm1, %v221_v44, 0.0  ;;  %v295_v14 = vsel %vm78_vm1, %v222_v57, 0.0  ;;  %v297_v11 = vsel %vm78_vm1, %v223_v7, 0.0  ;;  %v1370_v7 = vld [vmem:[#allocation50_spill] sm:$0xff] }
  0x30   :  { %v288_v24 = vadd.f32 %v287_v56, %v286_v35  ;;  %v299_v1 = vsel %vm78_vm1, %v224_v13, 0.0  ;;  %v1055_v50 = vsel %vm78_vm1, %v245_v18, 0.0  ;;  %v1058_v31 = vsel %vm78_vm1, %v246_v19, 0.0  ;;  %v1372_v56 = vld [vmem:[#allocation35_spill] sm:$0xff] }
  0x31   :  { %v127_v63 = vadd.f32 %v1369_v41, %v125_v3  ;;  %v1061_v26 = vsel %vm78_vm1, %v247_v21, 0.0  ;;  %v1064_v44 = vsel %vm78_vm1, %v248_v22, 0.0  ;;  %v1067_v57 = vsel %vm78_vm1, %v249_v23, 0.0 }
  0x32   :  { %v290_v55 = vadd.f32 %v289_v62, %v288_v24  ;;  %v1071_v13 = vsel %vm78_vm1, %v250_v45, 0.0  ;;  %v1074_v18 = vsel %vm78_vm1, %v251_v4, 0.0  ;;  %v1077_v19 = vsel %vm78_vm1, %v252_v27, 0.0  ;;  %v1374_v62 = vld [vmem:[#allocation36_spill] sm:$0xff] }
  0x33   :  { %v129_v10 = vadd.f32 %v1370_v7, %v127_v63  ;;  %v1080_v21 = vsel %vm78_vm1, %v253_v28, 0.0  ;;  %v1083_v22 = vsel %vm78_vm1, %v254_v29, 0.0  ;;  %v1086_v23 = vsel %vm78_vm1, %v255_v33, 0.0 }
  0x34   :  { %v292_v6 = vadd.f32 %v291_v9, %v290_v55  ;;  %v1090_v45 = vsel %vm78_vm1, %v256_v40, 0.0  ;;  %v1093_v4 = vsel %vm78_vm1, %v257_v42, 0.0  ;;  %v1096_v27 = vsel %vm78_vm1, %v258_v46, 0.0 }
  0x35   :  { %v131_v60 = vadd.f32 %v1371_v25, %v129_v10  ;;  %v1099_v28 = vsel %vm78_vm1, %v259_v47, 0.0  ;;  %v1102_v29 = vsel %vm78_vm1, %v260_v39, 0.0  ;;  %v1105_v33 = vsel %vm78_vm1, %v261_v48, 0.0  ;;  %v1376_v10 = vld [vmem:[#allocation38_spill] sm:$0xff] }
  0x36   :  { %v294_v15 = vadd.f32 %v293_v12, %v292_v6  ;;  %v1109_v40 = vsel %vm78_vm1, %v262_v37, 0.0  ;;  %v1112_v42 = vsel %vm78_vm1, %v263_v53, 0.0  ;;  %v1115_v46 = vsel %vm78_vm1, %v264_v54, 0.0  ;;  %v1377_v25 = vld [vmem:[#allocation2_spill] sm:$0xff] }
  0x37   :  { %v133_v51 = vadd.f32 %v940_v58, %v131_v60  ;;  %v1118_v47 = vsel %vm78_vm1, %v265_v38, 0.0  ;;  %v1121_v39 = vsel %vm78_vm1, %v266_v59, 0.0  ;;  %v1124_v48 = vsel %vm78_vm1, %v267_v36, 0.0 }
  0x38   :  { %v296_v0 = vadd.f32 %v295_v14, %v294_v15  ;;  %v1128_v37 = vsel %vm78_vm1, %v268_v61, 0.0  ;;  %v1131_v53 = vsel %vm78_vm1, %v269_v5, 0.0  ;;  %v1134_v54 = vsel %vm78_vm1, %v270_v52, 0.0 }
  0x39   :  { %v135_v58 = vadd.f32 %v944_v32, %v133_v51  ;;  %v1137_v38 = vsel %vm78_vm1, %v271_v8, 0.0  ;;  %v1140_v59 = vsel %vm78_vm1, %v272_v17, 0.0  ;;  %v1143_v36 = vsel %vm78_vm1, %v273_v20, 0.0  ;;  %v1148_v32 = vld [vmem:[%s1294_s0 + $0xf8] sm:$0xff]  ;;  %v1378_v51 = vld [vmem:[#allocation39_spill] sm:$0xff] }
  0x3a   :  { %v298_v5 = vadd.f32 %v297_v11, %v296_v0  ;;  %v1152_v52 = vsel %vm78_vm1, %v274_v49, 0.0  ;;  %v1155_v8 = vsel %vm78_vm1, %v275_v30, 0.0  ;;  %v140_v17 = vsel %vm78_vm1, %v1148_v32, 0.0 }
  0x3b   :  { %v137_v61 = vadd.f32 %v950_v43, %v135_v58  ;;  %v227_v20 = vmul.f32 %v1372_v56, %v1372_v56  ;;  %v301_v3 = vsel %vm78_vm1, %v972_v16, 0.0  ;;  %v1166_v43 = vld [vmem:[%s1294_s0 + $0x100] sm:$0xff]  ;;  %v228_v9 = vmul.f32 %v1374_v62, %v1374_v62  ;;  %v1375_v16 = vld [vmem:[#allocation37_spill] sm:$0xff]  ;;  %v1379_v58 = vld [vmem:[#allocation3_spill] sm:$0xff] }
  0x3c   :  { %v300_v35 = vadd.f32 %v299_v1, %v298_v5  ;;  %v142_v30 = vsel %vm78_vm1, %v1166_v43, 0.0  ;;  %v303_v12 = vsel %vm78_vm1, %v974_v2, 0.0  ;;  %v229_v41 = vmul.f32 %v1375_v16, %v1375_v16  ;;  %v1380_v5 = vld [vmem:[#allocation40_spill] sm:$0xff]  ;;  %v1383_v62 = vld [vmem:[#allocation5_spill] sm:$0xff] }
  0x3d   :  { %v139_v49 = vadd.f32 %v1373_v34, %v137_v61  ;;  %v305_v63 = vsel %vm78_vm1, %v227_v20, 0.0  ;;  %v230_v1 = vmul.f32 %v1376_v10, %v1376_v10  ;;  %v307_v55 = vsel %vm78_vm1, %v228_v9, 0.0  ;;  %v1381_v20 = vld [vmem:[#allocation4_spill] sm:$0xff] }
  0x3e   :  { %v302_v11 = vadd.f32 %v301_v3, %v300_v35  ;;  %v231_v2 = vmul.f32 %v1378_v51, %v1378_v51  ;;  %v309_v15 = vsel %vm78_vm1, %v229_v41, 0.0  ;;  %v1385_v41 = vld [vmem:[#allocation6_spill] sm:$0xff] }
  0x3f   :  { %v141_v14 = vadd.f32 %v140_v17, %v139_v49  ;;  %v232_v17 = vmul.f32 %v1380_v5, %v1380_v5  ;;  %v311_v56 = vsel %vm78_vm1, %v230_v1, 0.0  ;;  %v1382_v49 = vld [vmem:[#allocation41_spill] sm:$0xff] }
  0x40   :  { %v304_v7 = vadd.f32 %v303_v12, %v302_v11  ;;  %v233_v35 = vmul.f32 %v1382_v49, %v1382_v49 }
  0x41   :  { %v143_v24 = vadd.f32 %v142_v30, %v141_v14  ;;  %v313_v30 = vsel %vm78_vm1, %v231_v2, 0.0  ;;  %v1384_v14 = vld [vmem:[#allocation42_spill] sm:$0xff]  ;;  %v315_v16 = vsel %vm78_vm1, %v232_v17, 0.0 }
  0x42   :  { %v306_v6 = vadd.f32 %v305_v63, %v304_v7  ;;  %v234_v11 = vmul.f32 %v1384_v14, %v1384_v14  ;;  %v1386_v7 = vld [vmem:[#allocation43_spill] sm:$0xff]  ;;  %v317_v1 = vsel %vm78_vm1, %v233_v35, 0.0 }
  0x43   :  { %v145_v60 = vadd.f32 %v1377_v25, %v143_v24  ;;  %v235_v10 = vmul.f32 %v1386_v7, %v1386_v7 }
  0x44   :  { %v308_v61 = vadd.f32 %v307_v55, %v306_v6  ;;  %v1387_v55 = vld [vmem:[#allocation7_spill] sm:$0xff]  ;;  %v1388_v6 = vld [vmem:[#allocation44_spill] sm:$0xff]  ;;  %v319_v2 = vsel %vm78_vm1, %v234_v11, 0.0 }
  0x45   :  { %v147_v0 = vadd.f32 %v1379_v58, %v145_v60  ;;  %v236_v51 = vmul.f32 %v1388_v6, %v1388_v6  ;;  %v321_v17 = vsel %vm78_vm1, %v235_v10, 0.0 }
  0x46   :  { %v310_v34 = vadd.f32 %v309_v15, %v308_v61  ;;  %v1389_v15 = vld [vmem:[#allocation8_spill] sm:$0xff]  ;;  %v1390_v61 = vld [vmem:[#allocation45_spill] sm:$0xff] }
  0x47   :  { %v149_v3 = vadd.f32 %v1381_v20, %v147_v0  ;;  %v237_v5 = vmul.f32 %v1390_v61, %v1390_v61  ;;  %v323_v35 = vsel %vm78_vm1, %v236_v51, 0.0 }
  0x48   :  { %v312_v12 = vadd.f32 %v311_v56, %v310_v34  ;;  %v1391_v56 = vld [vmem:[#allocation9_spill] sm:$0xff]  ;;  %v1392_v34 = vld [vmem:[#allocation46_spill] sm:$0xff] }
  0x49   :  { %v151_v9 = vadd.f32 %v1383_v62, %v149_v3  ;;  %v238_v49 = vmul.f32 %v1392_v34, %v1392_v34  ;;  %v325_v11 = vsel %vm78_vm1, %v237_v5, 0.0 }
  0x4a   :  { %v314_v24 = vadd.f32 %v313_v30, %v312_v12  ;;  %v1393_v30 = vld [vmem:[#allocation10_spill] sm:$0xff]  ;;  %v1394_v12 = vld [vmem:[#allocation47_spill] sm:$0xff] }
  0x4b   :  { %v153_v63 = vadd.f32 %v1385_v41, %v151_v9  ;;  %v239_v14 = vmul.f32 %v1394_v12, %v1394_v12  ;;  %v327_v10 = vsel %vm78_vm1, %v238_v49, 0.0  ;;  %v1402_v49 = vld [vmem:[#allocation15_spill] sm:$0xff]  ;;  %v1403_v12 = vld [vmem:[#allocation16_spill] sm:$0xff] }
  0x4c   :  { %v316_v60 = vadd.f32 %v315_v16, %v314_v24  ;;  %v1395_v16 = vld [vmem:[#allocation11_spill] sm:$0xff]  ;;  %v1396_v24 = vld [vmem:[#allocation48_spill] sm:$0xff] }
  0x4d   :  { %v155_v25 = vadd.f32 %v1387_v55, %v153_v63  ;;  %v240_v7 = vmul.f32 %v1396_v24, %v1396_v24  ;;  %v329_v51 = vsel %vm78_vm1, %v239_v14, 0.0 }
  0x4e   :  { %v318_v0 = vadd.f32 %v317_v1, %v316_v60  ;;  %v1397_v1 = vld [vmem:[#allocation12_spill] sm:$0xff] }
  0x4f   :  { %v157_v58 = vadd.f32 %v1389_v15, %v155_v25  ;;  %v1398_v60 = vld [vmem:[#allocation52_spill] sm:$0xff]  ;;  %v331_v5 = vsel %vm78_vm1, %v240_v7, 0.0  ;;  %v1405_v7 = vld [vmem:[#allocation18_spill] sm:$0xff] }
  0x50   :  { %v320_v3 = vadd.f32 %v319_v2, %v318_v0  ;;  %v241_v6 = vmul.f32 %v1398_v60, %v1398_v60  ;;  %v1399_v2 = vld [vmem:[#allocation13_spill] sm:$0xff] }
  0x51   :  { %v159_v20 = vadd.f32 %v1391_v56, %v157_v58  ;;  %v1400_v0 = vld [vmem:[#allocation53_spill] sm:$0xff] }
  0x52   :  { %v322_v9 = vadd.f32 %v321_v17, %v320_v3  ;;  %v242_v61 = vmul.f32 %v1400_v0, %v1400_v0  ;;  %v1401_v17 = vld [vmem:[#allocation14_spill] sm:$0xff]  ;;  %v243_v3 = vmul.f32 %v1148_v32, %v1148_v32  ;;  %v333_v34 = vsel %vm78_vm1, %v241_v6, 0.0  ;;  %v1407_v6 = vld [vmem:[#allocation20_spill] sm:$0xff] }
  0x53   :  { %v161_v62 = vadd.f32 %v1393_v30, %v159_v20  ;;  %v1409_v0 = vld [vmem:[#allocation22_spill] sm:$0xff] }
  0x54   :  { %v324_v63 = vadd.f32 %v323_v35, %v322_v9  ;;  %v335_v9 = vsel %vm78_vm1, %v242_v61, 0.0 }
  0x55   :  { %v163_v41 = vadd.f32 %v1395_v16, %v161_v62  ;;  %v244_v62 = vmul.f32 %v1166_v43, %v1166_v43  ;;  %v337_v16 = vsel %vm78_vm1, %v243_v3, 0.0  ;;  %v1411_v3 = vld [vmem:[#allocation24_spill] sm:$0xff] }
  0x56   :  { %v326_v25 = vadd.f32 %v325_v11, %v324_v63 }
  0x57   :  { %v165_v55 = vadd.f32 %v1397_v1, %v163_v41  ;;  %v1404_v41 = vld [vmem:[#allocation17_spill] sm:$0xff]  ;;  %v339_v32 = vsel %vm78_vm1, %v244_v62, 0.0  ;;  %v1413_v62 = vld [vmem:[#allocation27_spill] sm:$0xff] }
  0x58   :  { %v328_v58 = vadd.f32 %v327_v10, %v326_v25 }
  0x59   :  { %v167_v15 = vadd.f32 %v1399_v2, %v165_v55  ;;  %v1406_v55 = vld [vmem:[#allocation19_spill] sm:$0xff]  ;;  %v1408_v2 = vld [vmem:[#allocation21_spill] sm:$0xff] }
  0x5a   :  { %v330_v20 = vadd.f32 %v329_v51, %v328_v58 }
  0x5b   :  { %v169_v56 = vadd.f32 %v1401_v17, %v167_v15  ;;  %v1410_v17 = vld [vmem:[#allocation23_spill] sm:$0xff] }
  0x5c   :  { %v332_v30 = vadd.f32 %v331_v5, %v330_v20 }
  0x5d   :  { %v171_v35 = vadd.f32 %v1402_v49, %v169_v56 }
  0x5e   :  { %v334_v11 = vadd.f32 %v333_v34, %v332_v30 }
  0x5f   :  { %v173_v14 = vadd.f32 %v1403_v12, %v171_v35  ;;  %v1412_v35 = vld [vmem:[#allocation25_spill] sm:$0xff]  ;;  %v1414_v12 = vld [vmem:[#allocation28_spill] sm:$0xff] }
  0x60   :  { %v336_v24 = vadd.f32 %v335_v9, %v334_v11  ;;  %v1415_v11 = vld [vmem:[#allocation29_spill] sm:$0xff] }
  0x61   :  { %v175_v63 = vadd.f32 %v1404_v41, %v173_v14  ;;  %v1416_v41 = vld [vmem:[#allocation31_spill] sm:$0xff] }
  0x62   :  { %v338_v1 = vadd.f32 %v337_v16, %v336_v24  ;;  %v1417_v24 = vld [vmem:[#allocation32_spill] sm:$0xff] }
  0x63   :  { %v177_v10 = vadd.f32 %v1405_v7, %v175_v63  ;;  %v1418_v7 = vld [vmem:[#allocation33_spill] sm:$0xff] }
  0x64   :  { %v340_v60 = vadd.f32 %v339_v32, %v338_v1  ;;  %v1419_v1 = vld [vmem:[#allocation34_spill] sm:$0xff] }
  0x65   :  { %v179_v25 = vadd.f32 %v1406_v55, %v177_v10 }
  0x66   :  { %v342_v51 = vadd.f32 %v1055_v50, %v340_v60 }
  0x67   :  { %v181_v43 = vadd.f32 %v1407_v6, %v179_v25 }
  0x68   :  { %v344_v58 = vadd.f32 %v1058_v31, %v342_v51 }
  0x69   :  { %v183_v15 = vadd.f32 %v1408_v2, %v181_v43 }
  0x6a   :  { %v346_v5 = vadd.f32 %v1061_v26, %v344_v58 }
  0x6b   :  { %v185_v61 = vadd.f32 %v1409_v0, %v183_v15 }
  0x6c   :  { %v348_v20 = vadd.f32 %v1064_v44, %v346_v5 }
  0x6d   :  { %v187_v56 = vadd.f32 %v1410_v17, %v185_v61 }
  0x6e   :  { %v350_v49 = vadd.f32 %v1067_v57, %v348_v20 }
  0x6f   :  { %v189_v34 = vadd.f32 %v1411_v3, %v187_v56 }
  0x70   :  { %v352_v50 = vadd.f32 %v1071_v13, %v350_v49 }
  0x71   :  { %v191_v30 = vadd.f32 %v1412_v35, %v189_v34 }
  0x72   :  { %v354_v31 = vadd.f32 %v1074_v18, %v352_v50 }
  0x73   :  { %v193_v9 = vadd.f32 %v1413_v62, %v191_v30 }
  0x74   :  { %v356_v26 = vadd.f32 %v1077_v19, %v354_v31 }
  0x75   :  { %v195_v14 = vadd.f32 %v1414_v12, %v193_v9 }
  0x76   :  { %v358_v44 = vadd.f32 %v1080_v21, %v356_v26 }
  0x77   :  { %v197_v16 = vadd.f32 %v1415_v11, %v195_v14 }
  0x78   :  { %v360_v57 = vadd.f32 %v1083_v22, %v358_v44 }
  0x79   :  { %v199_v63 = vadd.f32 %v1416_v41, %v197_v16 }
  0x7a   :  { %v362_v13 = vadd.f32 %v1086_v23, %v360_v57 }
  0x7b   :  { %v201_v32 = vadd.f32 %v1417_v24, %v199_v63 }
  0x7c   :  { %v364_v18 = vadd.f32 %v1090_v45, %v362_v13 }
  0x7d   :  { %v203_v10 = vadd.f32 %v1418_v7, %v201_v32 }
  0x7e   :  { %v366_v19 = vadd.f32 %v1093_v4, %v364_v18 }
  0x7f   :  { %v205_v55 = vadd.f32 %v1419_v1, %v203_v10 }
  0x80   :  { %v368_v25 = vadd.f32 %v1096_v27, %v366_v19 }
  0x81   :  { %v206_v2 = vrot.slane %v205_v55, 4 }
  0x82   :  { %v370_v21 = vadd.f32 %v1099_v28, %v368_v25 }
  0x84   :  { %v372_v60 = vadd.f32 %v1102_v29, %v370_v21 }
  0x86   :  { %v374_v22 = vadd.f32 %v1105_v33, %v372_v60 }
  0x88   :  { %v376_v6 = vadd.f32 %v1109_v40, %v374_v22  ;;  %v207_v40 = vadd.f32 %v206_v2, %v205_v55 }
  0x8a   :  { %v378_v23 = vadd.f32 %v1112_v42, %v376_v6  ;;  %v208_v15 = vrot.slane %v207_v40, 2 }
  0x8c   :  { %v380_v43 = vadd.f32 %v1115_v46, %v378_v23 }
  0x8e   :  { %v382_v45 = vadd.f32 %v1118_v47, %v380_v43 }
  0x90   :  { %v384_v51 = vadd.f32 %v1121_v39, %v382_v45 }
  0x92   :  { %v386_v4 = vadd.f32 %v1124_v48, %v384_v51  ;;  %v209_v48 = vadd.f32 %v208_v15, %v207_v40 }
  0x94   :  { %v388_v27 = vadd.f32 %v1128_v37, %v386_v4  ;;  %v210_v0 = vrot.slane %v209_v48, 1 }
  0x96   :  { %v390_v28 = vadd.f32 %v1131_v53, %v388_v27  ;;  %v211_v5 = vadd.f32 %v210_v0, %v209_v48 }
  0x98   :  { %v392_v29 = vadd.f32 %v1134_v54, %v390_v28 }
  0x9a   :  { %v394_v33 = vadd.f32 %v1137_v38, %v392_v29 }
  0x9c   :  { %v396_v42 = vadd.f32 %v1140_v59, %v394_v33  ;;  %v409_v59 = vld [vmem:[%s1295_s1] sm:$0x3] }
  0x9e   :  { %v398_v46 = vadd.f32 %v1143_v36, %v396_v42 }
  0xa0   :  { %v400_v47 = vadd.f32 %v1152_v52, %v398_v46 }
  0xa2   :  { %v402_v39 = vadd.f32 %v1155_v8, %v400_v47 }
  0xa4   :  { %v403_v58 = vrot.slane %v402_v39, 4 }
  0xa6   :  { %v404_v37 = vadd.f32 %v403_v58, %v402_v39 }
  0xa8   :  { %v405_v53 = vrot.slane %v404_v37, 2 }
  0xaa   :  { %v406_v61 = vadd.f32 %v405_v53, %v404_v37 }
  0xac   :  { %v407_v54 = vrot.slane %v406_v61, 1 }
  0xae   :  { %v408_v38 = vadd.f32 %v407_v54, %v406_v61 }
  0xb0   :  { %v411_v36 = vsel %vm410_vm2, %v211_v5, %v408_v38 }
  0xb1   :  { %v412_v17 = vadd.f32 %v411_v36, %v409_v59 }
  0xb3   :  { %414 = vst.msk [vmem:[%s1295_s1] sm:$0x3] %vm12_vm0, %v412_v17 }

// kernel: transition_forward.3
= control target key start
LH: loop header
LB: loop body
LE: loop exit
PB: predicated region body
PF: predicated region fallthrough
CT: control target
= control target key end

     0   :  { %s630_s15 = smov 0   ;;  %s738_s0 = inlined_call_operand.vmem [shape: f32[16,2,8,8], index: 0, kind: input, shape index: {}]   ;;  %s739_s1 = inlined_call_operand.vmem [shape: f32[1,8], index: 1, kind: input, shape index: {}]   ;;  %s740_s2 = inlined_call_operand.vmem [shape: f32[1,8], index: 2, kind: input, shape index: {}]   ;;  %s741_s3 = inlined_call_operand.vmem [shape: f32[4,8], index: 3, kind: input, shape index: {}]   ;;  %s742_s4 = inlined_call_operand.vmem [shape: f32[128,8], index: 4, kind: output, shape index: {}]  }
   0x1 LB: > { %s538_s16 = sadd.s32 4294967295, %s602_s15   ;;  %p542_p0 = scmp.ge.s32.totalorder %s602_s15, 1  ;;  %s602_s15 = sphi %s630_s15, %s14_s15  }
   0x2   : > { %p164_p1 = scmp.lt.s32.totalorder %s602_s15, 3 }
   0x4   : > { %p165_p2 = pnand %p542_p0, %p164_p1 }
   0x5   : > { %s543_s17 = sshll.u32 (!%p165_p2), %s538_s16, 3  ;;  %v644_v0 = vld [vmem:[%s739_s1] ss:$0 sm:$0xff] (!%p165_p2)  ;;  %vm364_vm0 = vcmask (!%p165_p2), 1043456   ;;  %s604_s28 = smov (!%p165_p2), 124   ;;  %vm339_vm1 = vcmask (!%p165_p2), 31744  }
   0x6   : > { %168 = sbr.rel (%p165_p2) target bundleno = 371 (0x173), region = 36  ;;  %p192_p3 = scmp.lt.s32.totalorder (!%p165_p2), %s543_s17, 15  ;;  %v654_v1 = vld [vmem:[%s740_s2] ss:$0 sm:$0xff] (!%p165_p2)  ;;  %vm473_vm2 = vcmask (!%p165_p2), 64512  }
   0x7   : > { %v338_v2 = vld [vmem:[%s741_s3] sm:$0xf] (!%p165_p2) }
   0x8   : > { %571 = vmatprep.subr.msk.mxu0 (!%p165_p2), %vm364_vm0, %v338_v2  ;;  %585 = vmatprep.subr.msk.mxu1 (!%p165_p2), %vm364_vm0, %v338_v2 }
   0x9   : > { %572 = vmatpush3.msk.msra.mxu0 (!%p165_p2), %vm364_vm0, %v338_v2  ;;  %586 = vmatpush3.msk.msra.mxu1 (!%p165_p2), %vm364_vm0, %v338_v2 }
   0xd   : > { %s744_s17 = smov (!%p192_p3, %s543_s17), 15 }
   0xe   : > { %s561_s18 = sshll.u32 %s744_s17, 4  ;;  %s547_s29 = sshll.u32 %s744_s17, 3 }
   0xf   : > { %s649_s23 = scalar_lea.vmem %s738_s0, %s561_s18  ;;  %s202_s6 = scalar_lea.vmem %s742_s4, %s547_s29 }
  0x10   : > { %v206_v3 = vld [vmem:[%s649_s23 + $0x10] sm:$0xff]  ;;  %v207_v4 = vld [vmem:[%s649_s23 + $0x18] sm:$0xff]  ;;  %v204_v5 = vld [vmem:[%s649_s23] sm:$0xff] }
  0x11   : > { %v229_v6 = vmul.f32 %v644_v0, %v206_v3  ;;  %v230_v7 = vmul.f32 %v644_v0, %v207_v4  ;;  %v205_v8 = vld [vmem:[%s649_s23 + $0x8] sm:$0xff]  ;;  %v227_v9 = vmul.f32 %v644_v0, %v204_v5  ;;  %v214_v10 = vld [vmem:[%s649_s23 + $0x50] sm:$0xff]  ;;  %v215_v11 = vld [vmem:[%s649_s23 + $0x58] sm:$0xff] }
  0x12   : > { %v228_v12 = vmul.f32 %v644_v0, %v205_v8  ;;  %v237_v13 = vmul.f32 %v644_v0, %v214_v10  ;;  %v238_v14 = vmul.f32 %v644_v0, %v215_v11  ;;  %v212_v15 = vld [vmem:[%s649_s23 + $0x40] sm:$0xff]  ;;  %v213_v16 = vld [vmem:[%s649_s23 + $0x48] sm:$0xff]  ;;  %v218_v37 = vld [vmem:[%s649_s23 + $0x70] sm:$0xff] }
  0x13   : > { %v252_v17 = vadd.f32 %v654_v1, %v229_v6  ;;  %v253_v18 = vadd.f32 %v654_v1, %v230_v7  ;;  %v250_v19 = vadd.f32 %v654_v1, %v227_v9  ;;  %v235_v20 = vmul.f32 %v644_v0, %v212_v15  ;;  %v216_v25 = vld [vmem:[%s649_s23 + $0x60] sm:$0xff]  ;;  %v217_v26 = vld [vmem:[%s649_s23 + $0x68] sm:$0xff]  ;;  %v219_v42 = vld [vmem:[%s649_s23 + $0x78] sm:$0xff] }
  0x14   : > { %v251_v21 = vadd.f32 %v654_v1, %v228_v12  ;;  %v260_v22 = vadd.f32 %v654_v1, %v237_v13  ;;  %v261_v23 = vadd.f32 %v654_v1, %v238_v14  ;;  %v236_v24 = vmul.f32 %v644_v0, %v213_v16  ;;  %v208_v31 = vld [vmem:[%s649_s23 + $0x20] sm:$0xff]  ;;  %v209_v36 = vld [vmem:[%s649_s23 + $0x28] sm:$0xff]  ;;  %v210_v43 = vld [vmem:[%s649_s23 + $0x30] sm:$0xff] }
  0x15   : > { %v268_v27 = vmax.f32 %v252_v17, 0.0  ;;  %v269_v28 = vmax.f32 %v253_v18, 0.0  ;;  %v266_v29 = vmax.f32 %v250_v19, 0.0  ;;  %v258_v30 = vadd.f32 %v654_v1, %v235_v20  ;;  %v211_v52 = vld [vmem:[%s649_s23 + $0x38] sm:$0xff] }
  0x16   : > { %v267_v32 = vmax.f32 %v251_v21, 0.0  ;;  %v276_v33 = vmax.f32 %v260_v22, 0.0  ;;  %v277_v34 = vmax.f32 %v261_v23, 0.0  ;;  %v259_v35 = vadd.f32 %v654_v1, %v236_v24 }
  0x17   : > { %v283_v38 = vadd.f32 %v269_v28, %v268_v27  ;;  %v274_v39 = vmax.f32 %v258_v30, 0.0  ;;  %v239_v40 = vmul.f32 %v644_v0, %v216_v25  ;;  %v240_v41 = vmul.f32 %v644_v0, %v217_v26 }
  0x18   : > { %v282_v44 = vadd.f32 %v267_v32, %v266_v29  ;;  %v287_v45 = vadd.f32 %v277_v34, %v276_v33  ;;  %v275_v46 = vmax.f32 %v259_v35, 0.0  ;;  %v231_v47 = vmul.f32 %v644_v0, %v208_v31 }
  0x19   : > { %300 = vrot.lane.b32.xlu1 %v283_v38, %s604_s28  ;;  %v262_v48 = vadd.f32 %v654_v1, %v239_v40  ;;  %v263_v49 = vadd.f32 %v654_v1, %v240_v41  ;;  %v232_v50 = vmul.f32 %v644_v0, %v209_v36  ;;  %v241_v51 = vmul.f32 %v644_v0, %v218_v37 }
  0x1a   : > { %298 = vrot.lane.b32.xlu0 %v282_v44, %s604_s28  ;;  %v286_v53 = vadd.f32 %v275_v46, %v274_v39  ;;  %v254_v54 = vadd.f32 %v654_v1, %v231_v47  ;;  %v242_v55 = vmul.f32 %v644_v0, %v219_v42  ;;  %v233_v56 = vmul.f32 %v644_v0, %v210_v43 }
  0x1b   : > { %v278_v57 = vmax.f32 %v262_v48, 0.0  ;;  %v279_v58 = vmax.f32 %v263_v49, 0.0  ;;  %v255_v59 = vadd.f32 %v654_v1, %v232_v50  ;;  %v264_v60 = vadd.f32 %v654_v1, %v241_v51 }
  0x1c   : > { %v270_v61 = vmax.f32 %v254_v54, 0.0  ;;  %v265_v62 = vadd.f32 %v654_v1, %v242_v55  ;;  %v234_v63 = vmul.f32 %v644_v0, %v211_v52  ;;  %v256_v2 = vadd.f32 %v654_v1, %v233_v56 }
  0x1d   : > { %308 = vrot.lane.b32.xlu1 %v287_v45, %s604_s28  ;;  %v288_v3 = vadd.f32 %v279_v58, %v278_v57  ;;  %v271_v4 = vmax.f32 %v255_v59, 0.0  ;;  %v280_v5 = vmax.f32 %v264_v60, 0.0 }
  0x1e   : > { %306 = vrot.lane.b32.xlu0 %v286_v53, %s604_s28  ;;  %v281_v6 = vmax.f32 %v265_v62, 0.0  ;;  %v257_v7 = vadd.f32 %v654_v1, %v234_v63  ;;  %v272_v8 = vmax.f32 %v256_v2, 0.0 }
  0x1f   : > { %v284_v9 = vadd.f32 %v271_v4, %v270_v61 }
  0x20   : > { %v273_v10 = vmax.f32 %v257_v7, 0.0  ;;  %v289_v11 = vadd.f32 %v281_v6, %v280_v5 }
  0x21   : > { %310 = vrot.lane.b32.xlu1 %v288_v3, %s604_s28 }
  0x22   : > { %302 = vrot.lane.b32.xlu0 %v284_v9, %s604_s28  ;;  %v285_v0 = vadd.f32 %v273_v10, %v272_v8 }
  0x25   : > { %312 = vrot.lane.b32.xlu1 %v289_v11, %s604_s28 }
  0x26   : > { %304 = vrot.lane.b32.xlu0 %v285_v0, %s604_s28 }
  0x8b   : > { %v301_v12 = vpop.permute.xlu1 %300 }
  0x8c   : > { %v323_v13 = vadd.f32 %v301_v12, %v283_v38  ;;  %v299_v14 = vpop.permute.xlu0 %298 }
  0x8d   : > { %v322_v15 = vadd.f32 %v299_v14, %v282_v44 }
  0x8e   : > { %v331_v16 = vmul.f32 0.25, %v323_v13 }
  0x8f   : > { %v330_v1 = vmul.f32 0.25, %v322_v15  ;;  %v309_v17 = vpop.permute.xlu1 %308 }
  0x90   : > { %v327_v18 = vadd.f32 %v309_v17, %v287_v45  ;;  %v307_v19 = vpop.permute.xlu0 %306 }
  0x91   : > { %v326_v20 = vadd.f32 %v307_v19, %v286_v53  ;;  %573 = vmatprep.mubr.msk.f32.mxu0 %vm339_vm1, %v330_v1 }
  0x92   : > { %v335_v21 = vmul.f32 0.25, %v327_v18  ;;  %574 = vmatmul.mubr.msk.f32.vlgmr.msra.gmra.mrb[0].mxu0 %vm339_vm1, %v331_v16 }
  0x93   : > { %v334_v22 = vmul.f32 0.25, %v326_v20  ;;  %v311_v23 = vpop.permute.xlu1 %310 }
  0x94   : > { %v328_v24 = vadd.f32 %v311_v23, %v288_v3  ;;  %v303_v25 = vpop.permute.xlu0 %302 }
  0x95   : > { %v324_v26 = vadd.f32 %v303_v25, %v284_v9  ;;  %579 = vmatprep.mubr.msk.f32.mxu1 %vm339_vm1, %v334_v22 }
  0x96   : > { %v336_v27 = vmul.f32 0.25, %v328_v24  ;;  %580 = vmatmul.mubr.msk.f32.vlgmr.msra.gmra.mrb[0].mxu1 %vm339_vm1, %v335_v21 }
  0x97   : > { %v332_v28 = vmul.f32 0.25, %v324_v26  ;;  %v313_v29 = vpop.permute.xlu1 %312 }
  0x98   : > { %v329_v30 = vadd.f32 %v313_v29, %v289_v11  ;;  %v305_v31 = vpop.permute.xlu0 %304  ;;  %582 = vmatprep.mubr.msk.f32.mxu1 %vm339_vm1, %v336_v27 }
  0x99   : > { %v325_v32 = vadd.f32 %v305_v31, %v285_v0  ;;  %576 = vmatprep.mubr.msk.f32.mxu0 %vm339_vm1, %v332_v28 }
  0x9a   : > { %v337_v33 = vmul.f32 0.25, %v329_v30 }
  0x9b   : > { %v333_v34 = vmul.f32 0.25, %v325_v32 }
  0x9c   : > { %583 = vmatmul.mubr.msk.f32.gmra.mrb[2].mxu1 %vm339_vm1, %v337_v33 }
  0x9d   : > { %577 = vmatmul.mubr.msk.f32.gmra.mrb[2].mxu0 %vm339_vm1, %v333_v34 }
 0x165   : > { %v575_v35 = vpop.f32.mrb[0].mxu0 }
 0x166   : > { %475 = vst.msk [vmem:[%s202_s6 + $0x8] sm:$0xff] %vm473_vm2, %v575_v35  ;;  %v434_v36 = vpop.f32.mrb[1].mxu0 }
 0x167   : > { %474 = vst.msk [vmem:[%s202_s6] sm:$0xff] %vm473_vm2, %v434_v36 }
 0x169   : > { %v581_v37 = vpop.f32.mrb[0].mxu1 }
 0x16a   : > { %479 = vst.msk [vmem:[%s202_s6 + $0x28] sm:$0xff] %vm473_vm2, %v581_v37  ;;  %v454_v38 = vpop.f32.mrb[1].mxu1 }
 0x16b   : > { %478 = vst.msk [vmem:[%s202_s6 + $0x20] sm:$0xff] %vm473_vm2, %v454_v38 }
 0x16f   : > { %v584_v39 = vpop.f32.mrb[2].mxu1 }
 0x170   : > { %v578_v40 = vpop.f32.mrb[2].mxu0  ;;  %481 = vst.msk [vmem:[%s202_s6 + $0x38] sm:$0xff] %vm473_vm2, %v584_v39  ;;  %v464_v41 = vpop.f32.mrb[3].mxu1 }
 0x171   : > { %477 = vst.msk [vmem:[%s202_s6 + $0x18] sm:$0xff] %vm473_vm2, %v578_v40  ;;  %v444_v42 = vpop.f32.mrb[3].mxu0  ;;  %480 = vst.msk [vmem:[%s202_s6 + $0x30] sm:$0xff] %vm473_vm2, %v464_v41 }
 0x172   : > { %476 = vst.msk [vmem:[%s202_s6 + $0x10] sm:$0xff] %vm473_vm2, %v444_v42 }
 0x173 PF: > { %s14_s15 = sadd.s32 1, %s602_s15  }
 0x174   : > { %p11_p4 = scmp.ge.s32.totalorder %s14_s15, 4  }
 0x176   :  { %13 = sbr.rel (!%p11_p4) target bundleno = 1 (0x1), region = 66 }

</bundles_post_ra>
